<compile_context>
chip_gen: v7x
topology: tpu7x:2x2x1
jax: 0.10.0
libtpu: 0.0.40
codegen_flags: <defaults>
</compile_context>

<pallas_src>
import jax
import jax.numpy as jnp
from jax import lax
from jax.experimental import pallas as pl
from jax.experimental.pallas import tpu as pltpu

_LANES = 128
_SUBLANES = 8
_MAX_ROW_TILE = 256


def _round_up(x, m):
    return -(-x // m) * m


def _vmem_limit_bytes():
    """Generation-aware VMEM limit: ~3/4 of physical capacity."""
    cap = 128 * 1024 * 1024
    try:
        info = pltpu.get_tpu_info()
        cap = int(getattr(info, "vmem_capacity_bytes", cap) or cap)
    except Exception:
        pass
    return max(32 * 1024 * 1024, (cap * 3) // 4)


def _gemm_bias_kernel(p_ref, w_ref, b_ref, o_ref):
    """One output row tile: (TM, K_fold) @ (K_fold, Cout_pad) + bias.

    p_ref: (1, TM, K_fold)      im2col patch rows (lane-dense K_fold)
    w_ref: (K_fold, Cout_pad)   folded conv weight (constant across grid)
    b_ref: (1, Cout_pad)        f32 bias row
    o_ref: (1, TM, Cout_pad)    output rows (lane-dense, unmasked stores)
    """
    acc = jnp.dot(p_ref[0], w_ref[...], preferred_element_type=jnp.float32)
    o_ref[0] = (acc + b_ref[...]).astype(o_ref.dtype)


def _gemm_bias(patches, w_fold, bias_row, tm):
    """pallas_call wrapper: batched row-tiled GEMM + bias."""
    B, R_pad, K_fold = patches.shape
    Cout_pad = w_fold.shape[-1]
    return pl.pallas_call(
        _gemm_bias_kernel,
        out_shape=jax.ShapeDtypeStruct((B, R_pad, Cout_pad), patches.dtype),
        grid_spec=pltpu.PrefetchScalarGridSpec(
            num_scalar_prefetch=0,
            grid=(B, R_pad // tm),
            in_specs=[
                pl.BlockSpec((1, tm, K_fold), lambda b, r: (b, r, 0)),
                pl.BlockSpec((K_fold, Cout_pad), lambda b, r: (0, 0)),
                pl.BlockSpec((1, Cout_pad), lambda b, r: (0, 0)),
            ],
            out_specs=pl.BlockSpec((1, tm, Cout_pad), lambda b, r: (b, r, 0)),
        ),
        compiler_params=pltpu.CompilerParams(
            dimension_semantics=("parallel", "parallel"),
            vmem_limit_bytes=_vmem_limit_bytes(),
        ),
    )(patches, w_fold, bias_row)


def coord_conv3d(x, weight, bias, *, stride=1, padding=0, only_spatial=False):
    """Forward pass of CoordConv3d.

    x:      (B, C, D, H, W) NCDHW
    weight: (Cout, C + (3 or 2), KD, KH, KW)  (PyTorch Conv3d layout)
    bias:   (Cout,)
    returns (B, Cout, D_out, H_out, W_out)
    """
    B, C, D, H, W = x.shape
    assert H == W, "reference coords3 uses linspace of length H along W -> requires H == W"
    Cout, Cin_tot, KD, KH, KW = weight.shape
    Ccoord = 2 if only_spatial else 3
    assert Cin_tot == C + Ccoord

    # ---- coordinate channels (matches torch.linspace/view/repeat exactly) ----
    lin_h = jnp.linspace(0.0, 1.0, H, dtype=x.dtype)
    c2 = jnp.broadcast_to(lin_h.reshape(1, 1, 1, H, 1), (1, 1, D, H, W))
    c3 = jnp.broadcast_to(lin_h.reshape(1, 1, 1, 1, H), (1, 1, D, H, W))
    if only_spatial:
        coords = jnp.concatenate([c2, c3], axis=1)
    else:
        lin_d = jnp.linspace(0.0, 1.0, D, dtype=x.dtype)
        c1 = jnp.broadcast_to(lin_d.reshape(1, 1, D, 1, 1), (1, 1, D, H, W))
        coords = jnp.concatenate([c1, c2, c3], axis=1)
    coords = jnp.broadcast_to(coords, (B,) + coords.shape[1:])
    # TODO(synk): when padding == 0 the coord-channel contribution is additively
    # separable into O(D+H+W) per-axis tables; exploiting it would drop the
    # Ccoord*KD*KH*KW extra contraction columns from the per-batch GEMM.
    xc = jnp.concatenate([x, coords], axis=1)          # (B, Cin_tot, D, H, W)

    # ---- output geometry ----
    Dp, Hp, Wp = D + 2 * padding, H + 2 * padding, W + 2 * padding
    D_out = (Dp - KD) // stride + 1
    H_out = (Hp - KH) // stride + 1
    W_out = (Wp - KW) // stride + 1
    R = D_out * H_out * W_out                          # flattened output rows
    K_fold = Cin_tot * KD * KH * KW                    # folded contraction dim

    # ---- im2col: (B, R, K_fold), tap-major / channel-minor feature order ----
    # TODO(synk): for large Cin the wrapper im2col multiplies input HBM traffic
    # by KD*KH*KW; an in-kernel gather of the shifted slices (manual DMA) would
    # avoid the blowup.
    if padding > 0:
        xc = jnp.pad(xc, ((0, 0), (0, 0), (padding,) * 2,
                          (padding,) * 2, (padding,) * 2))
    taps = []
    for kd in range(KD):
        for kh in range(KH):
            for kw in range(KW):
                taps.append(xc[:, :,
                               kd: kd + (D_out - 1) * stride + 1: stride,
                               kh: kh + (H_out - 1) * stride + 1: stride,
                               kw: kw + (W_out - 1) * stride + 1: stride])
    patches = jnp.stack(taps, axis=1)                     # (B, T, Cin, Do, Ho, Wo)
    patches = jnp.transpose(patches, (0, 3, 4, 5, 1, 2))  # (B, Do, Ho, Wo, T, Cin)
    patches = patches.reshape(B, R, K_fold)

    # Row tile: multiple of 8 sublanes, capped so VMEM use is shape-independent.
    tm = min(_MAX_ROW_TILE, _round_up(R, _SUBLANES))
    R_pad = _round_up(R, tm)
    if R_pad != R:
        patches = jnp.pad(patches, ((0, 0), (0, R_pad - R), (0, 0)))

    # ---- fold weights / bias; pad Cout to full lanes (multiple of 128) ----
    Cout_pad = _round_up(Cout, _LANES)
    w_fold = jnp.transpose(weight, (2, 3, 4, 1, 0)).reshape(K_fold, Cout)
    w_fold = jnp.pad(w_fold, ((0, 0), (0, Cout_pad - Cout))).astype(x.dtype)
    bias_row = jnp.pad(bias.astype(jnp.float32),
                       (0, Cout_pad - Cout)).reshape(1, Cout_pad)

    out_flat = _gemm_bias(patches, w_fold, bias_row, tm)  # (B, R_pad, Cout_pad)

    # crop row/channel padding, unflatten, -> NCDHW
    out = out_flat[:, :R, :Cout].reshape(B, D_out, H_out, W_out, Cout)
    return jnp.transpose(out, (0, 4, 1, 2, 3))


def _reference(x, weight, bias, *, stride=1, padding=0, only_spatial=False):
    """Pure-JAX reference (lax conv on the concatenated input)."""
    B, C, D, H, W = x.shape
    lin_h = jnp.linspace(0.0, 1.0, H, dtype=x.dtype)
    c2 = jnp.broadcast_to(lin_h.reshape(1, 1, 1, H, 1), (1, 1, D, H, W))
    c3 = jnp.broadcast_to(lin_h.reshape(1, 1, 1, 1, H), (1, 1, D, H, W))
    if only_spatial:
        coords = jnp.concatenate([c2, c3], axis=1)
    else:
        lin_d = jnp.linspace(0.0, 1.0, D, dtype=x.dtype)
        c1 = jnp.broadcast_to(lin_d.reshape(1, 1, D, 1, 1), (1, 1, D, H, W))
        coords = jnp.concatenate([c1, c2, c3], axis=1)
    coords = jnp.broadcast_to(coords, (B,) + coords.shape[1:])
    xc = jnp.concatenate([x, coords], axis=1)
    out = lax.conv_general_dilated(
        xc, weight, window_strides=(stride,) * 3,
        padding=[(padding, padding)] * 3,
        dimension_numbers=("NCDHW", "OIDHW", "NCDHW"))
    return out + bias.reshape(1, -1, 1, 1, 1)


if __name__ == "__main__":
    key = jax.random.PRNGKey(0)

    def run_case(k, *, B, C, D, H, Cout, K, stride, padding, only_spatial):
        kx, kw, kb = jax.random.split(k, 3)
        Cin_tot = C + (2 if only_spatial else 3)
        x = jax.random.normal(kx, (B, C, D, H, H), dtype=jnp.float32)
        weight = 0.1 * jax.random.normal(kw, (Cout, Cin_tot, K, K, K),
                                         dtype=jnp.float32)
        bias = 0.1 * jax.random.normal(kb, (Cout,), dtype=jnp.float32)

        out = coord_conv3d(x, weight, bias, stride=stride, padding=padding,
                           only_spatial=only_spatial)
        out = jax.block_until_ready(out)

        ref = _reference(x, weight, bias, stride=stride, padding=padding,
                         only_spatial=only_spatial)
        assert out.shape == ref.shape, (out.shape, ref.shape)
        err = jnp.max(jnp.abs(out - ref))
        assert jnp.allclose(out, ref, atol=2e-2, rtol=2e-2), f"max abs err {err}"

    k1, k2 = jax.random.split(key)
    # main config: B=2, C=4, D=6, H=W=8, Cout=5, 3x3x3, stride=1, padding=0
    run_case(k1, B=2, C=4, D=6, H=8, Cout=5, K=3, stride=1, padding=0,
             only_spatial=False)
    # exercise padding / stride / only_spatial code paths
    run_case(k2, B=2, C=4, D=6, H=8, Cout=5, K=3, stride=2, padding=1,
             only_spatial=True)

    print("KERNEL_OK")
</pallas_src>

<mosaic_0001>
module attributes {stable_mosaic.version = 11 : i64} {
  func.func @_gemm_bias_kernel(%arg0: i32, %arg1: i32, %arg2: memref<1x144x189xf32, #tpu.memory_space<vmem>>, %arg3: memref<189x128xf32, #tpu.memory_space<vmem>>, %arg4: memref<1x128xf32, #tpu.memory_space<vmem>>, %arg5: memref<1x144x128xf32, #tpu.memory_space<vmem>>) attributes {dimension_semantics = [#tpu.dimension_semantics<parallel>, #tpu.dimension_semantics<parallel>], iteration_bounds = array<i64: 2, 1>, scalar_prefetch = 0 : i64, scratch_operands = 0 : i64, tpu.core_type = #tpu.core_type<tc>, window_params = [{transform_indices = @transform_0, window_bounds = array<i64: 1, 144, 189>}, {pipeline_mode = #tpu.pipeline_mode<synchronous>, transform_indices = @transform_1, window_bounds = array<i64: 189, 128>}, {pipeline_mode = #tpu.pipeline_mode<synchronous>, transform_indices = @transform_2, window_bounds = array<i64: 1, 128>}, {transform_indices = @transform_3, window_bounds = array<i64: 1, 144, 128>}]} {
    %c0 = arith.constant 0 : index
    %c0_0 = arith.constant 0 : index
    %c0_1 = arith.constant 0 : index
    %0 = vector.load %arg2[%c0, %c0_0, %c0_1] : memref<1x144x189xf32, #tpu.memory_space<vmem>>, vector<1x144x189xf32>
    %1 = vector.shape_cast %0 : vector<1x144x189xf32> to vector<144x189xf32>
    %c0_2 = arith.constant 0 : index
    %c0_3 = arith.constant 0 : index
    %2 = vector.load %arg3[%c0_2, %c0_3] : memref<189x128xf32, #tpu.memory_space<vmem>>, vector<189x128xf32>
    %cst = arith.constant dense<0.000000e+00> : vector<144x128xf32>
    %3 = tpu.matmul %1, %2, %cst {dimension_numbers = #tpu.dot_dimension_numbers<[1], [0], [0], [1], [0, 0, 1, 1], [], []>} : vector<144x189xf32>, vector<189x128xf32>, vector<144x128xf32> -> vector<144x128xf32>
    %c0_4 = arith.constant 0 : index
    %c0_5 = arith.constant 0 : index
    %4 = vector.load %arg4[%c0_4, %c0_5] : memref<1x128xf32, #tpu.memory_space<vmem>>, vector<1x128xf32>
    %5 = vector.broadcast %4 : vector<1x128xf32> to vector<144x128xf32>
    %6 = arith.addf %3, %5 : vector<144x128xf32>
    %c0_6 = arith.constant 0 : index
    %c0_7 = arith.constant 0 : index
    %c0_8 = arith.constant 0 : index
    %7 = vector.load %arg5[%c0_6, %c0_7, %c0_8] : memref<1x144x128xf32, #tpu.memory_space<vmem>>, vector<1x144x128xf32>
    %8 = vector.shape_cast %7 : vector<1x144x128xf32> to vector<144x128xf32>
    %9 = vector.shape_cast %6 : vector<144x128xf32> to vector<1x144x128xf32>
    tpu.vector_store %arg5[%c0_6, %c0_7, %c0_8], %9 {strides = array<i32>} : memref<1x144x128xf32, #tpu.memory_space<vmem>>, vector<1x144x128xf32>,
    return
  }
  func.func @transform_0(%arg0: i32, %arg1: i32) -> (i32, i32, i32) {
    %c0_i32 = arith.constant 0 : i32
    %c0_i32_0 = arith.constant 0 : i32
    return %arg0, %arg1, %c0_i32 : i32, i32, i32
  }
  func.func @transform_1(%arg0: i32, %arg1: i32) -> (i32, i32) {
    %c0_i32 = arith.constant 0 : i32
    %c0_i32_0 = arith.constant 0 : i32
    %c0_i32_1 = arith.constant 0 : i32
    return %c0_i32, %c0_i32_0 : i32, i32
  }
  func.func @transform_2(%arg0: i32, %arg1: i32) -> (i32, i32) {
    %c0_i32 = arith.constant 0 : i32
    %c0_i32_0 = arith.constant 0 : i32
    %c0_i32_1 = arith.constant 0 : i32
    return %c0_i32, %c0_i32_0 : i32, i32
  }
  func.func @transform_3(%arg0: i32, %arg1: i32) -> (i32, i32, i32) {
    %c0_i32 = arith.constant 0 : i32
    %c0_i32_0 = arith.constant 0 : i32
    return %arg0, %arg1, %c0_i32 : i32, i32, i32
  }
}

</mosaic_0001>

<bundles_post_ra>
// kernel: tpu_custom_call.1
= control target key start
LH: loop header
LB: loop body
LE: loop exit
PB: predicated region body
PF: predicated region fallthrough
CT: control target
= control target key end

     0   :  { %8 = vsyncpa [#allocation3], 0  ;;  %s1430_s0 = inlined_call_operand.hbm [shape: f32[2,144,189], index: 0, kind: input, shape index: {}]   ;;  %s1431_s1 = inlined_call_operand.hbm [shape: f32[189,128], index: 1, kind: input, shape index: {}]   ;;  %s1432_s2 = inlined_call_operand.hbm [shape: f32[1,128], index: 2, kind: input, shape index: {}]   ;;  %s1433_s3 = inlined_call_operand.hbm [shape: f32[2,144,128], index: 3, kind: output, shape index: {}]  }
   0x1   :  { %10 = vsyncpa [#allocation3 + $0x1], 0 }
   0x2   :  { %11 = vsyncpa [#allocation6], 0 }
   0x3   :  { %12 = vsyncpa [#allocation4], 0 }
   0x4   :  { %14 = vsyncpa [#allocation4 + $0x1], 0  ;;  %s1054_s12 = smov 0   ;;  %s1056_s13 = smov 0  }
   0x5   :  { %s1058_s14 = smov 0   ;;  %s1060_s15 = smov 0  }
   0x6   :  { %s1062_s16 = smov 0   ;;  %s1064_s17 = smov 0  }
   0x7 LB: > { %s658_s18 = sadd.s32 4294967295, %s1020_s17   ;;  %s659_s19 = sadd.s32 4294967294, %s1020_s17   ;;  %s1020_s17 = sphi %s1064_s17, %s20_s17   ;;  %s1016_s16 = sphi %s1062_s16, %s1455_s16   ;;  %s1012_s15 = sphi %s1060_s15, %s1454_s15   ;;  %s1008_s14 = sphi %s1058_s14, %s1453_s14   ;;  %s1004_s13 = sphi %s1056_s13, %s1452_s13   ;;  %s1000_s12 = sphi %s1054_s12, %s1451_s12  }
   0x8   : > { %p54_p0 = scmp.ne.s32.totalorder %s1004_s13, %s1000_s12  ;;  %p1088_p1 = scmp.eq.s32.totalorder %s658_s18, 0 }
   0x9   : > { %p1092_p2 = scmp.eq.s32.totalorder %s658_s18, 1  ;;  %p128_p3 = scmp.eq.s32.totalorder %s659_s19, 1 }
   0xa   : > { %s1438_s20 = scalar_select %p1088_p1, 1, 0 }
   0xb   : > { %p1098_p4 = por %p1088_p1, %p54_p0  ;;  %p660_p5 = scmp.ge.s32.totalorder %s1020_s17, 1 }
   0xc   : > { %p1103_p6 = por %p128_p3, %p54_p0  ;;  %p135_p7 = scmp.lt.s32.totalorder %s1020_s17, 3 }
   0xd   : > { %s1440_s22 = scalar_select %p1098_p4, 1, 0 }
   0xe   : > { %s1441_s23 = scalar_select %p1103_p6, 1, 0 }
   0xf   : > { %p1108_p8 = pnand %p660_p5, %p135_p7  ;;  %s1022_s25 = smov [#allocation5]  }
  0x10   : > { %s147_s26 = sshll.u32 %s1022_s25, 4  ;;  %s1023_s28 = smov [#allocation7]   ;;  %s1112_s26 = int_to_ptr.vmem [resolvable:$true] %s147_s26 }
  0x11   : > { %p769_p9 = pneg %p1108_p8  ;;  %s161_s29 = sshll.u32 %s1023_s28, 4  ;;  %s1123_s29 = int_to_ptr.vmem [resolvable:$true] %s161_s29 }
  0x12   : > { %s848_s5 = scalar_lea.hbm %s1431_s1, 3072 }
  0x13   : > { %p1119_p11 = pnand %p769_p9, %p1088_p1  ;;  %p849_p12 = scmp.ne.s32.totalorder %s1431_s1, %s848_s5 }
  0x14   : > { %p855_p5 = scmp.lt.u32.totalorder %s848_s5, %s1431_s1 }
  0x15   : > { %p850_p13 = pneg %p1119_p11 }
  0x17   : > { %p851_p0 = pnand %p850_p13, %p849_p12 }
  0x19   : > { %p852_p3 = pneg %p851_p0 }
  0x1b   : > { %p857_p7 = pnand %p855_p5, %p852_p3 }
  0x1d   : > { %860 = shalt.err (!%p857_p7)
}
  0x1e   : > { %s861_s10 = scalar_lea.vmem %s1112_s26, 3072  ;;  %p869_p1 = scmp.lt.s32.totalorder %s1112_s26, %s1112_s26 }
  0x1f   : > { %p862_p9 = scmp.ne.s32.totalorder %s1112_s26, %s861_s10  ;;  %p870_p12 = scmp.lt.s32.totalorder %s861_s10, %s861_s10 }
  0x21   : > { %p864_p10 = pnand %p862_p9, %p850_p13  ;;  %p871_p0 = por %p870_p12, %p869_p1 }
  0x23   : > { %p865_p6 = pneg %p864_p10 }
  0x25   : > { %p872_p4 = pnand %p871_p0, %p865_p6 }
  0x27   : > { %875 = shalt.err (!%p872_p4)
}
  0x28   : > { %s1024_s11 = smov 128   ;;  %s1025_s18 = smov 8  }
  0x29   : > { %772 = dma.hbm_to_vmem [thread:$0]  (!%p1119_p11), %s1431_s1, 3072, %s1112_s26, [#allocation6], %s1024_s11, %s1024_s11, %s1025_s18  }
  0x2a   : > { %s876_s4 = scalar_lea.hbm %s1432_s2, 16 }
  0x2b   : > { %p877_p1 = scmp.ne.s32.totalorder %s1432_s2, %s876_s4  ;;  %p883_p10 = scmp.lt.u32.totalorder %s876_s4, %s1432_s2 }
  0x2d   : > { %p879_p4 = pnand %p877_p1, %p850_p13 }
  0x2f   : > { %p880_p6 = pneg %p879_p4 }
  0x31   : > { %p885_p3 = pnand %p883_p10, %p880_p6 }
  0x33   : > { %888 = shalt.err (!%p885_p3)
}
  0x34   : > { %s889_s26 = scalar_lea.vmem %s1123_s29, 16  ;;  %s896_s9 = scalar_lea.vmem %s1123_s29, 32 }
  0x35   : > { %p890_p5 = scmp.ne.s32.totalorder %s1123_s29, %s889_s26  ;;  %p897_p12 = scmp.lt.s32.totalorder %s1123_s29, %s1123_s29 }
  0x36   : > { %p898_p0 = scmp.lt.s32.totalorder %s896_s9, %s889_s26 }
  0x37   : > { %p892_p7 = pnand %p890_p5, %p850_p13 }
  0x38   : > { %p899_p1 = por %p898_p0, %p897_p12 }
  0x39   : > { %p893_p9 = pneg %p892_p7 }
  0x3b   : > { %p900_p4 = pnand %p899_p1, %p893_p9 }
  0x3d   : > { %903 = shalt.err (!%p900_p4)
}
  0x3e   : > { %775 = dma.hbm_to_vmem [thread:$0]  (!%p1119_p11), %s1432_s2, 16, %s1123_s29, [#allocation6]  }
  0x3f   : > { %s32_s18 = sadd.s32 1, %s1016_s16  ;;  %s41_s19 = sadd.s32 1, %s1008_s14 }
  0x40   : > { %p34_p13 = scmp.ge.s32.totalorder %s32_s18, 2  ;;  %p48_p6 = scmp.ne.s32.totalorder %s1008_s14, %s1004_s13 }
  0x41   : > { %p49_p10 = scmp.eq.s32.totalorder %s1020_s17, 0  ;;  %p786_p3 = scmp.lt.s32.totalorder %s1020_s17, 2 }
  0x42   : > { %s1457_s18 = smov (%p34_p13, %s32_s18), 0  ;;  %p1188_p7 = por %p1092_p2, %p48_p6 }
  0x43   : > { %p50_p5 = por %p49_p10, %p48_p6  ;;  %s36_s25 = ssub.s32 %s1016_s16, %s1457_s18 }
  0x44   : > { %s1444_s27 = scalar_select %p1188_p7, 1, 0 }
  0x45   : > { %s172_s28 = sand.u32 1, %s1008_s14   ;;  %p39_p9 = scmp.eq.s32.totalorder %s36_s25, 0 }
  0x46   : > { %s752_s29 = smul.u32 288, %s172_s28  ;;  %p1195_p11 = pnand %p786_p3, %p50_p5 }
  0x47   : > { %s1200_s4 = scalar_select %p39_p9, %s1008_s14, %s41_s19  }
  0x48   : > { %s753_s5 = smul.u32 4608, %s1016_s16  ;;  %s176_s6 = scalar_lea.vmem [#allocation2], %s752_s29 }
  0x49   : > { %s186_s7 = sshll.u32 %s176_s6, 4  ;;  %s1210_s9 = scalar_lea.sflag [#allocation3], %s172_s28  ;;  %s1208_s7 = int_to_ptr.vmem [resolvable:$true] %s186_s7 }
  0x4a   : > { %s1206_s26 = scalar_lea.hbm %s1430_s0, %s753_s5  ;;  %p906_p12 = pneg %p1195_p11 }
  0x4b   : > { %s904_s10 = scalar_lea.hbm %s1206_s26, 4608  ;;  %s909_s25 = scalar_lea.hbm %s1430_s0, 9216 }
  0x4c   : > { %p905_p2 = scmp.ne.s32.totalorder %s1206_s26, %s904_s10  ;;  %p910_p4 = scmp.lt.u32.totalorder %s1206_s26, %s1430_s0 }
  0x4d   : > { %p911_p13 = scmp.lt.u32.totalorder %s909_s25, %s904_s10  ;;  %p913_p10 = scmp.lt.u32.totalorder %s904_s10, %s1206_s26 }
  0x4e   : > { %p907_p0 = pnand %p906_p12, %p905_p2 }
  0x4f   : > { %p912_p6 = por %p911_p13, %p910_p4 }
  0x50   : > { %p908_p1 = pneg %p907_p0 }
  0x51   : > { %p914_p3 = por %p913_p10, %p912_p6 }
  0x53   : > { %p915_p5 = pnand %p914_p3, %p908_p1 }
  0x55   : > { %918 = shalt.err (!%p915_p5)
}
  0x56   : > { %s919_s28 = scalar_lea.vmem %s1208_s7, 4608  ;;  %s1026_s6 = smov [#allocation2]  }
  0x57   : > { %p920_p9 = scmp.ne.s32.totalorder %s1208_s7, %s919_s28  ;;  %s924_s21 = sshll.u32 %s1026_s6, 4  ;;  %s925_s21 = int_to_ptr.vmem [resolvable:$false] %s924_s21 }
  0x58   : > { %s926_s8 = scalar_lea.vmem %s925_s21, 9216  ;;  %p927_p7 = scmp.lt.s32.totalorder %s1208_s7, %s925_s21 }
  0x59   : > { %p922_p2 = pnand %p920_p9, %p906_p12  ;;  %p928_p4 = scmp.lt.s32.totalorder %s926_s8, %s919_s28 }
  0x5b   : > { %p923_p0 = pneg %p922_p2  ;;  %p929_p13 = por %p928_p4, %p927_p7 }
  0x5d   : > { %p930_p6 = pnand %p929_p13, %p923_p0 }
  0x5f   : > { %933 = shalt.err (!%p930_p6)
}
  0x60   : > { %s1027_s10 = smov 256   ;;  %s1028_s11 = smov 16  }
  0x61   : > { %779 = dma.hbm_to_vmem [thread:$0]  (!%p1195_p11), %s1206_s26, 4608, %s1208_s7, %s1210_s9, %s1027_s10, %s1027_s10, %s1028_s11  }
  0x62   : > { %198 = sbr.rel (%p1108_p8) target bundleno = 420 (0x1a4), region = 32  ;;  %s1241_s19 = sand.u32 (!%p1108_p8), 1, %s1004_s13  }
  0x63   : > { %s754_s25 = smul.u32 (!%p1108_p8), 288, %s1241_s19  ;;  %s201_s29 = scalar_lea.sflag (!%p1108_p8), [#allocation3], %s1241_s19 }
  0x64   : > { %p1446_p7 = scmp.ne.s32.totalorder (!%p1108_p8), %s1440_s22, 0 }
  0x65   : > { %s1245_s5 = scalar_lea.vmem (!%p1108_p8), [#allocation2], %s754_s25 }
  0x69   : > { %987 = dma.done.wait (%p1446_p7), %s201_s29, 4608  }
  0x6a   : > { %989 = vsyncadd (%p1446_p7), %s201_s29, 4294962688  ;;  %p1447_p11 = scmp.ne.s32.totalorder %s1438_s20, 0 }
  0x6c   : > { %991 = dma.done.wait (%p1447_p11), [#allocation6], 3088  }
  0x6d   : > { %993 = vsyncadd (%p1447_p11), [#allocation6], 4294964208  ;;  %v1029_v0 = vmov 0.0|0.0   ;;  %v273_v1 = vld [vmem:[#allocation5] sm:$0xff]  ;;  %v274_v2 = vld [vmem:[#allocation5 + $0x8] sm:$0xff]  ;;  %vm304_vm0 = vcmask 498688  }
  0x6e   : > { %691 = vmatprep.subr.bf16.mxu0 %v1029_v0  ;;  %728 = vmatprep.subr.bf16.mxu1 %v1029_v0  ;;  %v275_v3 = vld [vmem:[#allocation5 + $0x10] sm:$0xff]  ;;  %v692_v4 = vpack.c.bf16 %v274_v2, %v273_v1  ;;  %v276_v5 = vld [vmem:[#allocation5 + $0x18] sm:$0xff]  ;;  %v277_v7 = vld [vmem:[#allocation5 + $0x20] sm:$0xff]  ;;  %vm359_vm1 = vcmask 1044480   ;;  %vm1030_vm2 = vmmov 1   ;;  %s755_s20 = smul.u32 144, %s1241_s19 }
  0x6f   : > { %v695_v6 = vpack.c.bf16 %v276_v5, %v275_v3  ;;  %v278_v8 = vld [vmem:[#allocation5 + $0x28] sm:$0xff]  ;;  %v279_v10 = vld [vmem:[#allocation5 + $0x30] sm:$0xff]  ;;  %v280_v11 = vld [vmem:[#allocation5 + $0x38] sm:$0xff]  ;;  %s756_s24 = smul.u32 2304, %s1012_s15  ;;  %s537_s15 = scalar_lea.sflag [#allocation4], %s1241_s19 }
  0x70   : > { %693 = vmatpush1.bf16.msra.mxu0 %v692_v4  ;;  %740 = vmatpush1.bf16.msra.mxu1 %v692_v4  ;;  %v698_v9 = vpack.c.bf16 %v278_v8, %v277_v7  ;;  %v238_v12 = vld [vmem:[%s1245_s5 + $0x8] sm:$0xff]  ;;  %v256_v13 = vld [vmem:[%s1245_s5 + $0x98] sm:$0xff]  ;;  %v701_v14 = vpack.c.bf16 %v280_v11, %v279_v10  ;;  %v281_v15 = vld [vmem:[#allocation5 + $0x40] sm:$0xff]  ;;  %s1338_s22 = scalar_lea.vmem [#allocation8], %s755_s20  ;;  %p1448_p12 = scmp.ne.s32.totalorder %s1444_s27, 0 }
  0x71   : > { %694 = vmatprep.subr.bf16.mxu0 %v1029_v0  ;;  %729 = vmatprep.subr.bf16.mxu1 %v1029_v0  ;;  %v282_v16 = vld [vmem:[#allocation5 + $0x48] sm:$0xff]  ;;  %v283_v18 = vld [vmem:[#allocation5 + $0x50] sm:$0xff]  ;;  %v284_v19 = vld [vmem:[#allocation5 + $0x58] sm:$0xff]  ;;  %s552_s30 = sshll.u32 %s1338_s22, 4  ;;  %s1375_s9 = scalar_lea.hbm %s1433_s3, %s756_s24  ;;  %s1377_s30 = int_to_ptr.vmem [resolvable:$true] %s552_s30 }
  0x72   : > { %670 = vmatprep.mubr.msk.f32.mxu0 %vm304_vm0, %v238_v12  ;;  %679 = vmatprep.mubr.msk.f32.mxu1 %vm304_vm0, %v256_v13  ;;  %v704_v17 = vpack.c.bf16 %v282_v16, %v281_v15  ;;  %v707_v20 = vpack.c.bf16 %v284_v19, %v283_v18  ;;  %v285_v21 = vld [vmem:[#allocation5 + $0x60] sm:$0xff]  ;;  %v286_v22 = vld [vmem:[#allocation5 + $0x68] sm:$0xff]  ;;  %v287_v24 = vld [vmem:[#allocation5 + $0x70] sm:$0xff]  ;;  %s934_s28 = scalar_lea.vmem %s1377_s30, 2304  ;;  %s1031_s6 = smov [#allocation8]  }
  0x73   : > { %v710_v23 = vpack.c.bf16 %v286_v22, %v285_v21  ;;  %v288_v25 = vld [vmem:[#allocation5 + $0x78] sm:$0xff]  ;;  %v289_v27 = vld [vmem:[#allocation5 + $0x80] sm:$0xff]  ;;  %v290_v28 = vld [vmem:[#allocation5 + $0x88] sm:$0xff]  ;;  %p935_p8 = scmp.ne.s32.totalorder %s1377_s30, %s934_s28  ;;  %s938_s21 = sshll.u32 %s1031_s6, 4  ;;  %s939_s21 = int_to_ptr.vmem [resolvable:$false] %s938_s21 }
  0x74   : > { %696 = vmatpush1.bf16.msra.mxu0 %v695_v6  ;;  %741 = vmatpush1.bf16.msra.mxu1 %v695_v6  ;;  %v713_v26 = vpack.c.bf16 %v288_v25, %v287_v24  ;;  %v716_v29 = vpack.c.bf16 %v290_v28, %v289_v27  ;;  %v291_v30 = vld [vmem:[#allocation5 + $0x90] sm:$0xff]  ;;  %v292_v31 = vld [vmem:[#allocation5 + $0x98] sm:$0xff]  ;;  %v293_v33 = vld [vmem:[#allocation5 + $0xa0] sm:$0xff]  ;;  %s940_s8 = scalar_lea.vmem %s939_s21, 4608  ;;  %p941_p3 = scmp.lt.s32.totalorder %s1377_s30, %s939_s21 }
  0x75   : > { %697 = vmatprep.subr.bf16.mxu0 %v1029_v0  ;;  %730 = vmatprep.subr.bf16.mxu1 %v1029_v0  ;;  %v719_v32 = vpack.c.bf16 %v292_v31, %v291_v30  ;;  %v294_v34 = vld [vmem:[#allocation5 + $0xa8] sm:$0xff]  ;;  %v295_v36 = vld [vmem:[#allocation5 + $0xb0] sm:$0xff]  ;;  %v296_v37 = vld [vmem:[#allocation5 + $0xb8] sm:$0x1f]  ;;  %p936_p1 = pnand %p935_p8, %p1448_p12  ;;  %p942_p5 = scmp.lt.s32.totalorder %s940_s8, %s934_s28 }
  0x76   : > { %v722_v35 = vpack.c.bf16 %v294_v34, %v293_v33  ;;  %v725_v38 = vpack.c.bf16 %v296_v37, %v295_v36  ;;  %vm726_vm3 = vmpackc.low %vm359_vm1, %vm1030_vm2  ;;  %v237_v39 = vld [vmem:[%s1245_s5] sm:$0xff]  ;;  %v255_v40 = vld [vmem:[%s1245_s5 + $0x90] sm:$0xff] }
  0x77   : > { %v240_v41 = vld [vmem:[%s1245_s5 + $0x18] sm:$0xff]  ;;  %v258_v42 = vld [vmem:[%s1245_s5 + $0xa8] sm:$0xff]  ;;  %v239_v43 = vld [vmem:[%s1245_s5 + $0x10] sm:$0xff]  ;;  %p937_p10 = pneg %p936_p1  ;;  %p943_p9 = por %p942_p5, %p941_p3 }
  0x78   : > { %699 = vmatpush1.bf16.msra.mxu0 %v698_v9  ;;  %742 = vmatpush1.bf16.msra.mxu1 %v698_v9  ;;  %v257_v44 = vld [vmem:[%s1245_s5 + $0xa0] sm:$0xff]  ;;  %v242_v45 = vld [vmem:[%s1245_s5 + $0x28] sm:$0xff]  ;;  %v260_v46 = vld [vmem:[%s1245_s5 + $0xb8] sm:$0xff] }
  0x79   : > { %700 = vmatprep.subr.bf16.mxu0 %v1029_v0  ;;  %731 = vmatprep.subr.bf16.mxu1 %v1029_v0  ;;  %v241_v47 = vld [vmem:[%s1245_s5 + $0x20] sm:$0xff]  ;;  %v259_v48 = vld [vmem:[%s1245_s5 + $0xb0] sm:$0xff]  ;;  %v244_v49 = vld [vmem:[%s1245_s5 + $0x38] sm:$0xff]  ;;  %p944_p2 = pnand %p943_p9, %p937_p10 }
  0x7a   : > { %v262_v50 = vld [vmem:[%s1245_s5 + $0xc8] sm:$0xff]  ;;  %v243_v51 = vld [vmem:[%s1245_s5 + $0x30] sm:$0xff]  ;;  %v261_v52 = vld [vmem:[%s1245_s5 + $0xc0] sm:$0xff] }
  0x7b   : > { %v246_v53 = vld [vmem:[%s1245_s5 + $0x48] sm:$0xff]  ;;  %v264_v54 = vld [vmem:[%s1245_s5 + $0xd8] sm:$0xff]  ;;  %v245_v55 = vld [vmem:[%s1245_s5 + $0x40] sm:$0xff] }
  0x7c   : > { %702 = vmatpush1.bf16.msra.mxu0 %v701_v14  ;;  %743 = vmatpush1.bf16.msra.mxu1 %v701_v14  ;;  %v263_v56 = vld [vmem:[%s1245_s5 + $0xd0] sm:$0xff]  ;;  %v248_v57 = vld [vmem:[%s1245_s5 + $0x58] sm:$0xff]  ;;  %v266_v58 = vld [vmem:[%s1245_s5 + $0xe8] sm:$0xff] }
  0x7d   : > { %703 = vmatprep.subr.bf16.mxu0 %v1029_v0  ;;  %732 = vmatprep.subr.bf16.mxu1 %v1029_v0  ;;  %v247_v59 = vld [vmem:[%s1245_s5 + $0x50] sm:$0xff]  ;;  %v265_v60 = vld [vmem:[%s1245_s5 + $0xe0] sm:$0xff]  ;;  %v250_v61 = vld [vmem:[%s1245_s5 + $0x68] sm:$0xff] }
  0x7e   : > { %v268_v62 = vld [vmem:[%s1245_s5 + $0xf8] sm:$0xff]  ;;  %v249_v63 = vld [vmem:[%s1245_s5 + $0x60] sm:$0xff]  ;;  %v270_v2 = vld [vmem:[%s1245_s5 + $0x108] sm:$0xff] }
  0x7f   : > { %v252_v1 = vld [vmem:[%s1245_s5 + $0x78] sm:$0xff]  ;;  %v251_v3 = vld [vmem:[%s1245_s5 + $0x70] sm:$0xff]  ;;  %v269_v4 = vld [vmem:[%s1245_s5 + $0x100] sm:$0xff] }
  0x80   : > { %705 = vmatpush1.bf16.msra.mxu0 %v704_v17  ;;  %744 = vmatpush1.bf16.msra.mxu1 %v704_v17  ;;  %v254_v5 = vld [vmem:[%s1245_s5 + $0x88] sm:$0xff]  ;;  %v272_v6 = vld [vmem:[%s1245_s5 + $0x118] sm:$0xff]  ;;  %v253_v7 = vld [vmem:[%s1245_s5 + $0x80] sm:$0xff] }
  0x81   : > { %706 = vmatprep.subr.bf16.mxu0 %v1029_v0  ;;  %733 = vmatprep.subr.bf16.mxu1 %v1029_v0  ;;  %v271_v8 = vld [vmem:[%s1245_s5 + $0x110] sm:$0xff]  ;;  %v1334_v9 = vld [vmem:[#allocation7] ss:$0 sm:$0xff] }
  0x84   : > { %708 = vmatpush1.bf16.msra.mxu0 %v707_v20  ;;  %745 = vmatpush1.bf16.msra.mxu1 %v707_v20 }
  0x85   : > { %709 = vmatprep.subr.bf16.mxu0 %v1029_v0  ;;  %734 = vmatprep.subr.bf16.mxu1 %v1029_v0 }
  0x88   : > { %711 = vmatpush1.bf16.msra.mxu0 %v710_v23  ;;  %746 = vmatpush1.bf16.msra.mxu1 %v710_v23 }
  0x89   : > { %712 = vmatprep.subr.bf16.mxu0 %v1029_v0  ;;  %735 = vmatprep.subr.bf16.mxu1 %v1029_v0 }
  0x8c   : > { %714 = vmatpush1.bf16.msra.mxu0 %v713_v26  ;;  %747 = vmatpush1.bf16.msra.mxu1 %v713_v26 }
  0x8d   : > { %715 = vmatprep.subr.bf16.mxu0 %v1029_v0  ;;  %736 = vmatprep.subr.bf16.mxu1 %v1029_v0 }
  0x90   : > { %717 = vmatpush1.bf16.msra.mxu0 %v716_v29  ;;  %748 = vmatpush1.bf16.msra.mxu1 %v716_v29 }
  0x91   : > { %718 = vmatprep.subr.bf16.mxu0 %v1029_v0  ;;  %737 = vmatprep.subr.bf16.mxu1 %v1029_v0 }
  0x94   : > { %720 = vmatpush1.bf16.msra.mxu0 %v719_v32  ;;  %749 = vmatpush1.bf16.msra.mxu1 %v719_v32 }
  0x95   : > { %721 = vmatprep.subr.bf16.mxu0 %v1029_v0  ;;  %738 = vmatprep.subr.bf16.mxu1 %v1029_v0 }
  0x98   : > { %723 = vmatpush1.bf16.msra.mxu0 %v722_v35  ;;  %750 = vmatpush1.bf16.msra.mxu1 %v722_v35 }
  0x99   : > { %724 = vmatprep.subr.bf16.mxu0 %v1029_v0  ;;  %739 = vmatprep.subr.bf16.mxu1 %v1029_v0  ;;  %v267_v0 = vld [vmem:[%s1245_s5 + $0xf0] sm:$0xff] }
  0x9c   : > { %727 = vmatpush1.bf16.msk.msra.mxu0 %vm726_vm3, %v725_v38  ;;  %751 = vmatpush1.bf16.msk.msra.mxu1 %vm726_vm3, %v725_v38 }
  0x9f   : > { %428 = vmatmul.mubr.f32.vlgmr.msra.gmra.mrb[0].mxu0 %v237_v39  ;;  %473 = vmatmul.mubr.f32.vlgmr.msra.gmra.mrb[0].mxu1 %v255_v40 }
  0xa0   : > { %671 = vmatprep.mubr.msk.f32.mxu0 %vm304_vm0, %v240_v41  ;;  %680 = vmatprep.mubr.msk.f32.mxu1 %vm304_vm0, %v258_v42 }
  0xa3   : > { %433 = vmatmul.mubr.f32.gmra.mrb[2].mxu0 %v239_v43  ;;  %478 = vmatmul.mubr.f32.gmra.mrb[2].mxu1 %v257_v44 }
  0xa4   : > { %672 = vmatprep.mubr.msk.f32.mxu0 %vm304_vm0, %v242_v45  ;;  %681 = vmatprep.mubr.msk.f32.mxu1 %vm304_vm0, %v260_v46 }
  0xa7   : > { %438 = vmatmul.mubr.f32.gmra.mrb[4].mxu0 %v241_v47  ;;  %483 = vmatmul.mubr.f32.gmra.mrb[4].mxu1 %v259_v48 }
  0xa8   : > { %673 = vmatprep.mubr.msk.f32.mxu0 %vm304_vm0, %v244_v49  ;;  %682 = vmatprep.mubr.msk.f32.mxu1 %vm304_vm0, %v262_v50 }
  0xab   : > { %443 = vmatmul.mubr.f32.gmra.mrb[6].mxu0 %v243_v51  ;;  %488 = vmatmul.mubr.f32.gmra.mrb[6].mxu1 %v261_v52 }
  0xac   : > { %674 = vmatprep.mubr.msk.f32.mxu0 %vm304_vm0, %v246_v53  ;;  %683 = vmatprep.mubr.msk.f32.mxu1 %vm304_vm0, %v264_v54 }
  0xaf   : > { %448 = vmatmul.mubr.f32.gmra.mrb[8].mxu0 %v245_v55  ;;  %493 = vmatmul.mubr.f32.gmra.mrb[8].mxu1 %v263_v56 }
  0xb0   : > { %675 = vmatprep.mubr.msk.f32.mxu0 %vm304_vm0, %v248_v57  ;;  %684 = vmatprep.mubr.msk.f32.mxu1 %vm304_vm0, %v266_v58 }
  0xb3   : > { %453 = vmatmul.mubr.f32.gmra.mrb[10].mxu0 %v247_v59  ;;  %498 = vmatmul.mubr.f32.gmra.mrb[10].mxu1 %v265_v60 }
  0xb4   : > { %676 = vmatprep.mubr.msk.f32.mxu0 %vm304_vm0, %v250_v61  ;;  %685 = vmatprep.mubr.msk.f32.mxu1 %vm304_vm0, %v268_v62 }
  0xb7   : > { %458 = vmatmul.mubr.f32.gmra.mrb[12].mxu0 %v249_v63  ;;  %503 = vmatmul.mubr.f32.gmra.mrb[12].mxu1 %v267_v0 }
  0xb8   : > { %677 = vmatprep.mubr.msk.f32.mxu0 %vm304_vm0, %v252_v1  ;;  %686 = vmatprep.mubr.msk.f32.mxu1 %vm304_vm0, %v270_v2 }
  0xbb   : > { %463 = vmatmul.mubr.f32.gmra.mrb[14].mxu0 %v251_v3  ;;  %508 = vmatmul.mubr.f32.gmra.mrb[14].mxu1 %v269_v4 }
  0xbc   : > { %678 = vmatprep.mubr.msk.f32.mxu0 %vm304_vm0, %v254_v5  ;;  %687 = vmatprep.mubr.msk.f32.mxu1 %vm304_vm0, %v272_v6 }
  0xbf   : > { %468 = vmatmul.mubr.f32.gmra.mrb[16].mxu0 %v253_v7  ;;  %513 = vmatmul.mubr.f32.gmra.mrb[16].mxu1 %v271_v8 }
 0x172   : > { %v429_v10 = vpop.f32.mrb[0].mxu0  ;;  %v474_v11 = vpop.f32.mrb[0].mxu1 }
 0x173   : > { %v430_v12 = vadd.f32 %v1334_v9, %v429_v10  ;;  %v475_v13 = vadd.f32 %v1334_v9, %v474_v11  ;;  %v431_v14 = vpop.f32.mrb[1].mxu0  ;;  %v476_v15 = vpop.f32.mrb[1].mxu1 }
 0x175   : > { %518 = vst [vmem:[%s1338_s22] sm:$0xff] %v430_v12  ;;  %527 = vst [vmem:[%s1338_s22 + $0x48] sm:$0xff] %v475_v13 }
 0x176   : > { %v434_v16 = vpop.f32.mrb[2].mxu0  ;;  %v479_v17 = vpop.f32.mrb[2].mxu1 }
 0x177   : > { %v435_v18 = vadd.f32 %v1334_v9, %v434_v16  ;;  %v480_v19 = vadd.f32 %v1334_v9, %v479_v17  ;;  %v436_v20 = vpop.f32.mrb[3].mxu0  ;;  %v481_v21 = vpop.f32.mrb[3].mxu1 }
 0x179   : > { %519 = vst [vmem:[%s1338_s22 + $0x8] sm:$0xff] %v435_v18  ;;  %528 = vst [vmem:[%s1338_s22 + $0x50] sm:$0xff] %v480_v19 }
 0x17a   : > { %v439_v22 = vpop.f32.mrb[4].mxu0  ;;  %v484_v23 = vpop.f32.mrb[4].mxu1 }
 0x17b   : > { %v440_v24 = vadd.f32 %v1334_v9, %v439_v22  ;;  %v485_v25 = vadd.f32 %v1334_v9, %v484_v23  ;;  %v441_v26 = vpop.f32.mrb[5].mxu0  ;;  %v486_v27 = vpop.f32.mrb[5].mxu1 }
 0x17d   : > { %520 = vst [vmem:[%s1338_s22 + $0x10] sm:$0xff] %v440_v24  ;;  %529 = vst [vmem:[%s1338_s22 + $0x58] sm:$0xff] %v485_v25 }
 0x17e   : > { %v444_v28 = vpop.f32.mrb[6].mxu0  ;;  %v489_v29 = vpop.f32.mrb[6].mxu1 }
 0x17f   : > { %v445_v30 = vadd.f32 %v1334_v9, %v444_v28  ;;  %v490_v31 = vadd.f32 %v1334_v9, %v489_v29  ;;  %v446_v32 = vpop.f32.mrb[7].mxu0  ;;  %v491_v33 = vpop.f32.mrb[7].mxu1 }
 0x181   : > { %521 = vst [vmem:[%s1338_s22 + $0x18] sm:$0xff] %v445_v30  ;;  %530 = vst [vmem:[%s1338_s22 + $0x60] sm:$0xff] %v490_v31 }
 0x182   : > { %v449_v34 = vpop.f32.mrb[8].mxu0  ;;  %v494_v35 = vpop.f32.mrb[8].mxu1 }
 0x183   : > { %v450_v36 = vadd.f32 %v1334_v9, %v449_v34  ;;  %v495_v37 = vadd.f32 %v1334_v9, %v494_v35  ;;  %v451_v38 = vpop.f32.mrb[9].mxu0  ;;  %v496_v39 = vpop.f32.mrb[9].mxu1 }
 0x185   : > { %522 = vst [vmem:[%s1338_s22 + $0x20] sm:$0xff] %v450_v36  ;;  %531 = vst [vmem:[%s1338_s22 + $0x68] sm:$0xff] %v495_v37 }
 0x186   : > { %v454_v40 = vpop.f32.mrb[10].mxu0  ;;  %v499_v41 = vpop.f32.mrb[10].mxu1 }
 0x187   : > { %v455_v42 = vadd.f32 %v1334_v9, %v454_v40  ;;  %v500_v43 = vadd.f32 %v1334_v9, %v499_v41  ;;  %v456_v44 = vpop.f32.mrb[11].mxu0  ;;  %v501_v45 = vpop.f32.mrb[11].mxu1 }
 0x189   : > { %523 = vst [vmem:[%s1338_s22 + $0x28] sm:$0xff] %v455_v42  ;;  %532 = vst [vmem:[%s1338_s22 + $0x70] sm:$0xff] %v500_v43 }
 0x18a   : > { %v459_v46 = vpop.f32.mrb[12].mxu0  ;;  %v504_v47 = vpop.f32.mrb[12].mxu1 }
 0x18b   : > { %v460_v48 = vadd.f32 %v1334_v9, %v459_v46  ;;  %v505_v49 = vadd.f32 %v1334_v9, %v504_v47  ;;  %v461_v50 = vpop.f32.mrb[13].mxu0  ;;  %v506_v51 = vpop.f32.mrb[13].mxu1 }
 0x18d   : > { %524 = vst [vmem:[%s1338_s22 + $0x30] sm:$0xff] %v460_v48  ;;  %533 = vst [vmem:[%s1338_s22 + $0x78] sm:$0xff] %v505_v49 }
 0x18e   : > { %v464_v52 = vpop.f32.mrb[14].mxu0  ;;  %v509_v53 = vpop.f32.mrb[14].mxu1 }
 0x18f   : > { %v465_v54 = vadd.f32 %v1334_v9, %v464_v52  ;;  %v510_v55 = vadd.f32 %v1334_v9, %v509_v53  ;;  %v466_v56 = vpop.f32.mrb[15].mxu0  ;;  %v511_v57 = vpop.f32.mrb[15].mxu1 }
 0x191   : > { %525 = vst [vmem:[%s1338_s22 + $0x38] sm:$0xff] %v465_v54  ;;  %534 = vst [vmem:[%s1338_s22 + $0x80] sm:$0xff] %v510_v55 }
 0x192   : > { %v469_v58 = vpop.f32.mrb[16].mxu0  ;;  %v514_v59 = vpop.f32.mrb[16].mxu1 }
 0x193   : > { %v470_v60 = vadd.f32 %v1334_v9, %v469_v58  ;;  %v515_v61 = vadd.f32 %v1334_v9, %v514_v59  ;;  %v471_v62 = vpop.f32.mrb[17].mxu0  ;;  %v516_v63 = vpop.f32.mrb[17].mxu1 }
 0x195   : > { %526 = vst [vmem:[%s1338_s22 + $0x40] sm:$0xff] %v470_v60  ;;  %535 = vst [vmem:[%s1338_s22 + $0x88] sm:$0xff] %v515_v61 }
 0x196   : > { %947 = shalt.err (!%p944_p2)
}
 0x197   : > { %s948_s10 = scalar_lea.hbm %s1375_s9, 2304  ;;  %s952_s29 = scalar_lea.hbm %s1433_s3, 4608 }
 0x198   : > { %p949_p0 = scmp.ne.s32.totalorder %s1375_s9, %s948_s10  ;;  %p953_p6 = scmp.lt.u32.totalorder %s1375_s9, %s1433_s3 }
 0x199   : > { %p954_p7 = scmp.lt.u32.totalorder %s952_s29, %s948_s10  ;;  %p956_p8 = scmp.lt.u32.totalorder %s948_s10, %s1375_s9 }
 0x19a   : > { %p950_p4 = pnand %p949_p0, %p1448_p12 }
 0x19b   : > { %p955_p11 = por %p954_p7, %p953_p6 }
 0x19c   : > { %p951_p13 = pneg %p950_p4 }
 0x19d   : > { %p957_p1 = por %p956_p8, %p955_p11 }
 0x19f   : > { %p958_p10 = pnand %p957_p1, %p951_p13 }
 0x1a1   : > { %961 = shalt.err (!%p958_p10)
}
 0x1a2   : > { %s1032_s22 = smov 128   ;;  %s1033_s24 = smov 8  }
 0x1a3   : > { %767 = dma.vmem_to_hbm [thread:$0]  (%p1448_p12), %s1377_s30, 2304, %s1375_s9, %s537_s15, %s1032_s22, %s1032_s22, %s1033_s24  }
 0x1a4 PF: > { %s567_s7 = sand.u32 1, %s1000_s12   ;;  %p1449_p3 = scmp.ne.s32.totalorder %s1441_s23, 0 }
 0x1a5   : > { %p1450_p5 = scmp.ge.s32.totalorder %s1020_s17, 2  ;;  %s568_s26 = scalar_lea.sflag [#allocation4], %s567_s7 }
 0x1a7   : > { %p781_p9 = pnand %p1450_p5, %p1449_p3 }
 0x1a9   : > { %995 = dma.done.wait (!%p781_p9), %s568_s26, 2304  }
 0x1aa   : > { %997 = vsyncadd (!%p781_p9), %s568_s26, 4294964992  ;;  %s20_s17 = sadd.s32 1, %s1020_s17   ;;  %s1451_s12 = smov %s1004_s13 }
 0x1ab   : > { %p17_p2 = scmp.ge.s32.totalorder %s20_s17, 4   ;;  %s1452_s13 = smov %s1008_s14 }
 0x1ac   : > { %s1453_s14 = smov %s1200_s4  ;;  %s1454_s15 = smov %s1016_s16 }
 0x1ad   : > { %s1455_s16 = smov %s1457_s18  ;;  %19 = sbr.rel (!%p17_p2) target bundleno = 7 (0x7), region = 85 }
 0x1b4   :  { %573 = vsyncpa [#allocation3], 1 }
 0x1b5   :  { %575 = vsyncpa [#allocation3 + $0x1], 1 }
 0x1b6   :  { %576 = vsyncpa [#allocation6], 1 }
 0x1b7   :  { %577 = vsyncpa [#allocation4], 1 }
 0x1b8   :  { %579 = vsyncpa [#allocation4 + $0x1], 1 }

</bundles_post_ra>
